<compile_context>
chip_gen: v6e
topology: v6e:2x2x1
jax: 0.10.0
libtpu: 0.0.40
codegen_flags: <defaults>
</compile_context>

<pallas_src>
import functools
import math

import jax
import jax.numpy as jnp
from jax.experimental import pallas as pl
from jax.experimental.pallas import tpu as pltpu


def _round_up(x, m):
    return (x + m - 1) // m * m


# ----------------------------- Pallas kernel ------------------------------ #

def _fused_fc_kernel(*refs, num_layers: int):
    """Fused MLP over one row tile: h = x; h = h @ W_l + b_l (ReLU except last).

    refs layout: (x_ref, w0, b0, w1, b1, ..., w_{L-1}, b_{L-1}, o_ref).
    Inter-layer feature dims are padded to 128 with zero weight cols/rows and
    zero bias entries, so padded columns stay exactly zero through every layer;
    first-layer K and last-layer N are the true (unpadded) sizes.
    """
    x_ref = refs[0]
    o_ref = refs[-1]

    h = x_ref[...]                                   # [TM, K]  (f32 or bf16)
    for l in range(num_layers):                      # statically unrolled (small L)
        w = refs[1 + 2 * l][...]                     # [K_l, N_l]
        b = refs[2 + 2 * l][...]                     # [1, N_l]  (f32)
        h = jnp.dot(h.astype(w.dtype), w,
                    preferred_element_type=jnp.float32) + b.astype(jnp.float32)
        if l < num_layers - 1:
            h = jnp.maximum(h, 0.0)                  # ReLU (Dropout(p=0) = identity)
    o_ref[...] = h.astype(o_ref.dtype)


# ------------------------------ Fc module --------------------------------- #

def fc_layer_sizes(inp_size, target_size, num_layers, flat=False):
    """Mirror of Fc.create_layers size computation."""
    if flat:
        sizes = [inp_size] + [target_size for _ in range(num_layers)]
    else:
        mult = (target_size / inp_size) ** (1.0 / num_layers)
        sizes = [int(inp_size * mult ** ii) for ii in range(num_layers)]
        sizes.append(target_size)
    return sizes


def init_fc_params(key, sizes, dtype=jnp.float32):
    """nn.Linear-default init (uniform +-1/sqrt(fan_in)); weights stored (in, out)."""
    params = []
    for ii in range(len(sizes) - 1):
        fan_in, fan_out = sizes[ii], sizes[ii + 1]
        key, kw, kb = jax.random.split(key, 3)
        bound = 1.0 / math.sqrt(fan_in)
        w_t = jax.random.uniform(kw, (fan_in, fan_out), dtype,
                                 minval=-bound, maxval=bound)
        b = jax.random.uniform(kb, (fan_out,), dtype,
                               minval=-bound, maxval=bound)
        params.append((w_t, b))
    return params


def fc_forward(params, x, target_size, *, tm=1024, cast_dtype=None):
    """Forward pass of Fc with one fused Pallas kernel.

    x: [batch, seq, inp_size] -> [batch, -1, target_size]
    cast_dtype: optional narrow dtype (e.g. jnp.bfloat16) for x and weights to
                halve DMA bytes; accumulation / bias / ReLU stay in float32.
    """
    bs = x.shape[0]
    out_dtype = x.dtype
    x2 = x.reshape((-1, x.shape[-1]))                 # flatten(0, 1) -> [M, K]
    if cast_dtype is not None:
        x2 = x2.astype(cast_dtype)
    M, K = x2.shape
    num_layers = len(params)
    in_itemsize = jnp.dtype(x2.dtype).itemsize
    out_itemsize = jnp.dtype(out_dtype).itemsize

    # --- row tiling: no M padding; keep >= 2 grid steps when possible -------
    align = 16 if in_itemsize == 2 else 8             # sublane alignment for dtype
    Ma = _round_up(M, align)
    TM = _round_up(min(tm, Ma), align)
    if pl.cdiv(M, TM) < 2 and Ma > align:
        # >= 2 grid steps so the "parallel" axis shards across v7x's 2 TCs.
        TM = _round_up(Ma // 2, align)
    grid = (pl.cdiv(M, TM),)

    # --- weights: pad ONLY inter-layer output dims to 128 -------------------
    # (first-layer K and last-layer N stay at their true sizes; padded weight
    #  rows/cols and biases are zero so real columns are bit-exact.)
    # NOTE: if hidden sizes grow past 128 and the kernel becomes MXU-bound on
    # v6e/v7x, padding to multiples of 256 fills the 256-wide MXU; at current
    # sizes the kernel is DMA-bound so 128 is preferred.
    padded_params = []
    layer_dims = []                                   # (K_l, N_l) per layer
    in_dim = K
    for l, (w_t, b) in enumerate(params):
        kin, nout = w_t.shape
        n_pad = nout if l == num_layers - 1 else _round_up(nout, 128)
        w_src = w_t.astype(cast_dtype) if cast_dtype is not None else w_t
        w_p = jnp.zeros((in_dim, n_pad), w_src.dtype).at[:kin, :nout].set(w_src)
        b_p = jnp.zeros((1, n_pad), jnp.float32).at[0, :nout].set(
            b.astype(jnp.float32))
        padded_params.append((w_p, b_p))
        layer_dims.append((in_dim, n_pad))
        in_dim = n_pad
    N_out = in_dim                                    # == target_size (unpadded)

    # Weights/biases are resident across row tiles (constant index_map); when
    # they are large, single-buffer them to halve their VMEM footprint.
    w_resident_bytes = sum(w.size * w.dtype.itemsize + b.size * b.dtype.itemsize
                           for (w, b) in padded_params)
    single_buffer_weights = w_resident_bytes > (4 << 20)

    # --- specs ---------------------------------------------------------------
    def _row_map(i):
        return (i, 0)

    def _const_map(i):
        return (0, 0)

    in_specs = [pl.BlockSpec((TM, K), _row_map)]      # last dim == full array dim
    flat_wb = []
    for (kp, np_), (w_p, b_p) in zip(layer_dims, padded_params):
        if single_buffer_weights:
            in_specs.append(pl.BlockSpec((kp, np_), _const_map,
                                         pipeline_mode=pl.Buffered(1)))
            in_specs.append(pl.BlockSpec((1, np_), _const_map,
                                         pipeline_mode=pl.Buffered(1)))
        else:
            in_specs.append(pl.BlockSpec((kp, np_), _const_map))
            in_specs.append(pl.BlockSpec((1, np_), _const_map))
        flat_wb.extend([w_p, b_p])
    # Output kept at true target_size (no 128-lane padding, no wrapper slice).
    out_specs = pl.BlockSpec((TM, N_out), _row_map)

    # --- explicit VMEM budget -------------------------------------------------
    max_lane = max(np_ for (_, np_) in layer_dims)
    stream_bytes = 2 * (TM * K * in_itemsize + TM * N_out * out_itemsize)  # dbl-buffered I/O
    weight_bytes = w_resident_bytes * (1 if single_buffer_weights else 2)
    inter_bytes = num_layers * TM * max_lane * 4                            # unrolled f32 h's
    needed = stream_bytes + weight_bytes + inter_bytes
    vmem_limit = int(min(max(2 * needed, 16 << 20), 48 << 20))              # safe v5e/v6e/v7x

    # --- cost estimate on true traffic -----------------------------------------
    flops = sum(2 * M * kp * np_ for (kp, np_) in layer_dims)
    bytes_accessed = (M * K * in_itemsize + w_resident_bytes
                      + M * N_out * out_itemsize)
    cost = pl.CostEstimate(flops=int(flops), transcendentals=0,
                           bytes_accessed=int(bytes_accessed))

    kernel = functools.partial(_fused_fc_kernel, num_layers=num_layers)
    out = pl.pallas_call(
        kernel,
        out_shape=jax.ShapeDtypeStruct((M, N_out), out_dtype),
        grid=grid,
        in_specs=in_specs,
        out_specs=out_specs,
        compiler_params=pltpu.CompilerParams(
            dimension_semantics=("parallel",),
            vmem_limit_bytes=vmem_limit),
        cost_estimate=cost,
    )(x2, *flat_wb)

    return out.reshape((bs, -1, target_size))


# ------------------------------ reference --------------------------------- #

def fc_forward_ref(params, x, target_size):
    bs = x.shape[0]
    x2 = x.reshape((-1, x.shape[-1]))
    for (w_t, b) in params[:-1]:
        x2 = jnp.maximum(x2 @ w_t + b, 0.0)
    w_t, b = params[-1]
    x2 = x2 @ w_t + b
    return x2.reshape((bs, -1, target_size))


# --------------------------------- main ------------------------------------ #

if __name__ == "__main__":
    # Fc(inp_size=32, target_size=16, num_layers=3), batch=2, seq=8.
    inp_size, target_size, num_layers = 32, 16, 3
    batch, seq = 2, 8

    sizes = fc_layer_sizes(inp_size, target_size, num_layers, flat=False)

    key = jax.random.PRNGKey(0)
    key, kx = jax.random.split(key)
    params = init_fc_params(key, sizes)
    x = jax.random.normal(kx, (batch, seq, inp_size), jnp.float32)

    ref = fc_forward_ref(params, x, target_size)

    # f32 path (bit-exact in real columns vs the unpadded math).
    fwd = jax.jit(functools.partial(fc_forward, target_size=target_size))
    out = jax.block_until_ready(fwd(params, x))
    assert out.shape == (batch, seq, target_size), out.shape
    assert jnp.allclose(out, ref, atol=1e-5, rtol=1e-5), "f32 mismatch vs reference"

    # bf16-cast path (halved input/weight DMA bytes, f32 accumulation).
    fwd_bf16 = jax.jit(functools.partial(fc_forward, target_size=target_size,
                                         cast_dtype=jnp.bfloat16))
    out_b = jax.block_until_ready(fwd_bf16(params, x))
    assert out_b.shape == (batch, seq, target_size), out_b.shape
    assert jnp.allclose(out_b, ref, atol=1e-1, rtol=1e-1), "bf16 mismatch vs reference"

    print("KERNEL_OK")
</pallas_src>

<mosaic_0001>
module attributes {stable_mosaic.version = 11 : i64} {
  func.func @_fused_fc_kernel(%arg0: i32, %arg1: memref<8x32xf32, #tpu.memory_space<vmem>>, %arg2: memref<32x128xf32, #tpu.memory_space<vmem>>, %arg3: memref<1x128xf32, #tpu.memory_space<vmem>>, %arg4: memref<128x128xf32, #tpu.memory_space<vmem>>, %arg5: memref<1x128xf32, #tpu.memory_space<vmem>>, %arg6: memref<128x16xf32, #tpu.memory_space<vmem>>, %arg7: memref<1x16xf32, #tpu.memory_space<vmem>>, %arg8: memref<8x16xf32, #tpu.memory_space<vmem>>) attributes {dimension_semantics = [#tpu.dimension_semantics<parallel>], iteration_bounds = array<i64: 2>, scalar_prefetch = 0 : i64, scratch_operands = 0 : i64, tpu.core_type = #tpu.core_type<tc>, window_params = [{transform_indices = @transform_0, window_bounds = array<i64: 8, 32>}, {pipeline_mode = #tpu.pipeline_mode<synchronous>, transform_indices = @transform_1, window_bounds = array<i64: 32, 128>}, {pipeline_mode = #tpu.pipeline_mode<synchronous>, transform_indices = @transform_2, window_bounds = array<i64: 1, 128>}, {pipeline_mode = #tpu.pipeline_mode<synchronous>, transform_indices = @transform_3, window_bounds = array<i64: 128, 128>}, {pipeline_mode = #tpu.pipeline_mode<synchronous>, transform_indices = @transform_4, window_bounds = array<i64: 1, 128>}, {pipeline_mode = #tpu.pipeline_mode<synchronous>, transform_indices = @transform_5, window_bounds = array<i64: 128, 16>}, {pipeline_mode = #tpu.pipeline_mode<synchronous>, transform_indices = @transform_6, window_bounds = array<i64: 1, 16>}, {transform_indices = @transform_7, window_bounds = array<i64: 8, 16>}]} {
    %c0 = arith.constant 0 : index
    %c0_0 = arith.constant 0 : index
    %0 = vector.load %arg1[%c0, %c0_0] : memref<8x32xf32, #tpu.memory_space<vmem>>, vector<8x32xf32>
    %c0_1 = arith.constant 0 : index
    %c0_2 = arith.constant 0 : index
    %1 = vector.load %arg2[%c0_1, %c0_2] : memref<32x128xf32, #tpu.memory_space<vmem>>, vector<32x128xf32>
    %c0_3 = arith.constant 0 : index
    %c0_4 = arith.constant 0 : index
    %2 = vector.load %arg3[%c0_3, %c0_4] : memref<1x128xf32, #tpu.memory_space<vmem>>, vector<1x128xf32>
    %cst = arith.constant dense<0.000000e+00> : vector<8x128xf32>
    %3 = tpu.matmul %0, %1, %cst {dimension_numbers = #tpu.dot_dimension_numbers<[1], [0], [0], [1], [0, 0, 1, 1], [], []>} : vector<8x32xf32>, vector<32x128xf32>, vector<8x128xf32> -> vector<8x128xf32>
    %4 = vector.broadcast %2 : vector<1x128xf32> to vector<8x128xf32>
    %5 = arith.addf %3, %4 : vector<8x128xf32>
    %cst_5 = arith.constant 0.000000e+00 : f32
    %6 = vector.broadcast %cst_5 : f32 to vector<8x128xf32>
    %7 = arith.maximumf %5, %6 : vector<8x128xf32>
    %c0_6 = arith.constant 0 : index
    %c0_7 = arith.constant 0 : index
    %8 = vector.load %arg4[%c0_6, %c0_7] : memref<128x128xf32, #tpu.memory_space<vmem>>, vector<128x128xf32>
    %c0_8 = arith.constant 0 : index
    %c0_9 = arith.constant 0 : index
    %9 = vector.load %arg5[%c0_8, %c0_9] : memref<1x128xf32, #tpu.memory_space<vmem>>, vector<1x128xf32>
    %cst_10 = arith.constant dense<0.000000e+00> : vector<8x128xf32>
    %10 = tpu.matmul %7, %8, %cst_10 {dimension_numbers = #tpu.dot_dimension_numbers<[1], [0], [0], [1], [0, 0, 1, 1], [], []>} : vector<8x128xf32>, vector<128x128xf32>, vector<8x128xf32> -> vector<8x128xf32>
    %11 = vector.broadcast %9 : vector<1x128xf32> to vector<8x128xf32>
    %12 = arith.addf %10, %11 : vector<8x128xf32>
    %cst_11 = arith.constant 0.000000e+00 : f32
    %13 = vector.broadcast %cst_11 : f32 to vector<8x128xf32>
    %14 = arith.maximumf %12, %13 : vector<8x128xf32>
    %c0_12 = arith.constant 0 : index
    %c0_13 = arith.constant 0 : index
    %15 = vector.load %arg6[%c0_12, %c0_13] : memref<128x16xf32, #tpu.memory_space<vmem>>, vector<128x16xf32>
    %c0_14 = arith.constant 0 : index
    %c0_15 = arith.constant 0 : index
    %16 = vector.load %arg7[%c0_14, %c0_15] : memref<1x16xf32, #tpu.memory_space<vmem>>, vector<1x16xf32>
    %cst_16 = arith.constant dense<0.000000e+00> : vector<8x16xf32>
    %17 = tpu.matmul %14, %15, %cst_16 {dimension_numbers = #tpu.dot_dimension_numbers<[1], [0], [0], [1], [0, 0, 1, 1], [], []>} : vector<8x128xf32>, vector<128x16xf32>, vector<8x16xf32> -> vector<8x16xf32>
    %18 = vector.broadcast %16 : vector<1x16xf32> to vector<8x16xf32>
    %19 = arith.addf %17, %18 : vector<8x16xf32>
    %c0_17 = arith.constant 0 : index
    %c0_18 = arith.constant 0 : index
    %20 = vector.load %arg8[%c0_17, %c0_18] : memref<8x16xf32, #tpu.memory_space<vmem>>, vector<8x16xf32>
    tpu.vector_store %arg8[%c0_17, %c0_18], %19 {strides = array<i32>} : memref<8x16xf32, #tpu.memory_space<vmem>>, vector<8x16xf32>,
    return
  }
  func.func @transform_0(%arg0: i32) -> (i32, i32) {
    %c0_i32 = arith.constant 0 : i32
    %c0_i32_0 = arith.constant 0 : i32
    return %arg0, %c0_i32 : i32, i32
  }
  func.func @transform_1(%arg0: i32) -> (i32, i32) {
    %c0_i32 = arith.constant 0 : i32
    %c0_i32_0 = arith.constant 0 : i32
    %c0_i32_1 = arith.constant 0 : i32
    return %c0_i32, %c0_i32_0 : i32, i32
  }
  func.func @transform_2(%arg0: i32) -> (i32, i32) {
    %c0_i32 = arith.constant 0 : i32
    %c0_i32_0 = arith.constant 0 : i32
    %c0_i32_1 = arith.constant 0 : i32
    return %c0_i32, %c0_i32_0 : i32, i32
  }
  func.func @transform_3(%arg0: i32) -> (i32, i32) {
    %c0_i32 = arith.constant 0 : i32
    %c0_i32_0 = arith.constant 0 : i32
    %c0_i32_1 = arith.constant 0 : i32
    return %c0_i32, %c0_i32_0 : i32, i32
  }
  func.func @transform_4(%arg0: i32) -> (i32, i32) {
    %c0_i32 = arith.constant 0 : i32
    %c0_i32_0 = arith.constant 0 : i32
    %c0_i32_1 = arith.constant 0 : i32
    return %c0_i32, %c0_i32_0 : i32, i32
  }
  func.func @transform_5(%arg0: i32) -> (i32, i32) {
    %c0_i32 = arith.constant 0 : i32
    %c0_i32_0 = arith.constant 0 : i32
    %c0_i32_1 = arith.constant 0 : i32
    return %c0_i32, %c0_i32_0 : i32, i32
  }
  func.func @transform_6(%arg0: i32) -> (i32, i32) {
    %c0_i32 = arith.constant 0 : i32
    %c0_i32_0 = arith.constant 0 : i32
    %c0_i32_1 = arith.constant 0 : i32
    return %c0_i32, %c0_i32_0 : i32, i32
  }
  func.func @transform_7(%arg0: i32) -> (i32, i32) {
    %c0_i32 = arith.constant 0 : i32
    %c0_i32_0 = arith.constant 0 : i32
    return %arg0, %c0_i32 : i32, i32
  }
}

</mosaic_0001>

<bundles_post_ra>
// kernel: fc_forward.1
= control target key start
LH: loop header
LB: loop body
LE: loop exit
PB: predicated region body
PF: predicated region fallthrough
CT: control target
= control target key end

     0   :  { %12 = vsyncpa [#allocation3], 0  ;;  %s1155_s0 = inlined_call_operand.vmem [shape: f32[16,32], index: 0, kind: input, shape index: {}]   ;;  %s1156_s1 = inlined_call_operand.vmem [shape: f32[32,128], index: 1, kind: input, shape index: {}]   ;;  %s1157_s2 = inlined_call_operand.vmem [shape: f32[1,128], index: 2, kind: input, shape index: {}]   ;;  %s1158_s3 = inlined_call_operand.vmem [shape: f32[128,128], index: 3, kind: input, shape index: {}]   ;;  %s1159_s4 = inlined_call_operand.vmem [shape: f32[1,128], index: 4, kind: input, shape index: {}]   ;;  %s1160_s5 = inlined_call_operand.vmem [shape: f32[128,16], index: 5, kind: input, shape index: {}]   ;;  %s1161_s6 = inlined_call_operand.vmem [shape: f32[1,16], index: 6, kind: input, shape index: {}]   ;;  %s1162_s7 = inlined_call_operand.hbm [shape: f32[16,16], index: 7, kind: output, shape index: {}]  }
   0x1   :  { %14 = vsyncpa [#allocation3 + $0x1], 0  ;;  %s903_s24 = smov 0   ;;  %s905_s25 = smov 0  }
   0x2   :  { %s907_s26 = smov 0   ;;  %s909_s27 = smov 0  }
   0x3 LB: > { %s924_s28 = sadd.s32 4294967295, %s858_s27   ;;  %s623_s29 = sadd.s32 4294967294, %s858_s27   ;;  %s858_s27 = sphi %s909_s27, %s1168_s27   ;;  %s854_s26 = sphi %s907_s26, %s1167_s26   ;;  %s850_s25 = sphi %s905_s25, %s1166_s25   ;;  %s846_s24 = sphi %s903_s24, %s1165_s24  }
   0x4   : > { %s928_s30 = sadd.s32 1, %s858_s27   ;;  %s179_s8 = sadd.s32 1, %s854_s26 }
   0x5   : > { %s176_s9 = ssub.s32 %s858_s27, %s928_s30  ;;  %p189_p0 = scmp.ne.s32.totalorder %s854_s26, %s850_s25 }
   0x6   : > { %p177_p1 = scmp.eq.s32.totalorder %s176_s9, 0  ;;  %p190_p2 = scmp.eq.s32.totalorder %s924_s28, 1 }
   0x7   : > { %p195_p3 = scmp.ne.s32.totalorder %s850_s25, %s846_s24  ;;  %p196_p4 = scmp.eq.s32.totalorder %s623_s29, 1 }
   0x8   : > { %s939_s10 = scalar_select %p177_p1, %s854_s26, %s179_s8  }
   0x9   : > { %p941_p5 = por %p190_p2, %p189_p0  ;;  %p945_p6 = por %p196_p4, %p195_p3 }
   0xa   : > { %p626_p7 = scmp.ge.s32.totalorder %s858_s27, 1  ;;  %p239_p8 = scmp.lt.s32.totalorder %s858_s27, 3 }
   0xc   : > { %p240_p9 = pnand %p626_p7, %p239_p8 }
   0xd   : > { %p270_p10 = scmp.lt.s32.totalorder (!%p240_p9), %s924_s28, 1  ;;  %s634_s14 = sshll.u32 (!%p240_p9), %s924_s28, 7 }
   0xe   : > { %243 = sbr.rel (%p240_p9) target bundleno = 630 (0x276), region = 48 }
  0x13   : > { %v278_v0 = vld [vmem:[%s1156_s1 + $0x18] sm:$0xff]  ;;  %v860_v1 = vmov 0.0   ;;  %v277_v2 = vld [vmem:[%s1156_s1 + $0x10] sm:$0xff]  ;;  %vm861_vm0 = vmmov 0   ;;  %s271_s19 = scalar_select %p270_p10, %s924_s28, 1  ;;  %v276_v5 = vld [vmem:[%s1156_s1 + $0x8] sm:$0xff] }
  0x14   : > { %676 = vmatprep.subr.mxu0 %v860_v1  ;;  %684 = vmatprep.mubr.msk.f32.mxu0 %vm861_vm0, %v860_v1  ;;  %v376_v3 = vld [vmem:[%s1158_s3 + $0x78] sm:$0xff]  ;;  %v375_v4 = vld [vmem:[%s1158_s3 + $0x70] sm:$0xff]  ;;  %v374_v6 = vld [vmem:[%s1158_s3 + $0x68] sm:$0xff]  ;;  %vm286_vm1 = vcmask 261120   ;;  %vm548_vm2 = vcmask 130048   ;;  %s862_s28 = smov [#allocation2]  }
  0x15   : > { %677 = vmatpush3.msra.mxu0 %v278_v0  ;;  %687 = vmatprep.subr.mxu1 %v860_v1  ;;  %s628_s29 = sshll.u32 %s271_s19, 3  ;;  %v275_v7 = vld [vmem:[%s1156_s1] sm:$0xff]  ;;  %v372_v10 = vld [vmem:[%s1158_s3 + $0x58] sm:$0xff]  ;;  %v371_v11 = vld [vmem:[%s1158_s3 + $0x50] sm:$0xff]  ;;  %s1120_s19 = scalar_lea.hbm %s1162_s7, %s634_s14 }
  0x16   : > { %678 = vmatprep.subr.mxu0 %v860_v1  ;;  %688 = vmatpush3.msra.mxu1 %v376_v3  ;;  %s273_s17 = scalar_lea.vmem %s1155_s0, %s628_s29  ;;  %v373_v9 = vld [vmem:[%s1158_s3 + $0x60] sm:$0xff]  ;;  %v370_v12 = vld [vmem:[%s1158_s3 + $0x48] sm:$0xff]  ;;  %v368_v14 = vld [vmem:[%s1158_s3 + $0x38] sm:$0xff]  ;;  %s267_s29 = sand.u32 1, %s850_s25  }
  0x17   : > { %679 = vmatpush3.msra.mxu0 %v277_v2  ;;  %689 = vmatprep.subr.mxu1 %v860_v1  ;;  %v274_v8 = vld [vmem:[%s273_s17] sm:$0xff]  ;;  %v367_v15 = vld [vmem:[%s1158_s3 + $0x30] sm:$0xff]  ;;  %v366_v16 = vld [vmem:[%s1158_s3 + $0x28] sm:$0xff]  ;;  %s627_s8 = sshll.u32 %s267_s29, 3  ;;  %s551_s20 = scalar_lea.sflag [#allocation3], %s267_s29 }
  0x18   : > { %680 = vmatprep.subr.mxu0 %v860_v1  ;;  %690 = vmatpush3.msra.mxu1 %v375_v4  ;;  %v369_v13 = vld [vmem:[%s1158_s3 + $0x40] sm:$0xff]  ;;  %v364_v18 = vld [vmem:[%s1158_s3 + $0x18] sm:$0xff]  ;;  %v363_v19 = vld [vmem:[%s1158_s3 + $0x10] sm:$0xff]  ;;  %s269_s15 = scalar_lea.vmem [#allocation2], %s627_s8  ;;  %s802_s22 = sshll.u32 %s862_s28, 4  ;;  %s803_s22 = int_to_ptr.vmem [resolvable:$false] %s802_s22 }
  0x19   : > { %681 = vmatpush3.msra.mxu0 %v276_v5  ;;  %691 = vmatprep.subr.mxu1 %v860_v1  ;;  %v365_v17 = vld [vmem:[%s1158_s3 + $0x20] sm:$0xff]  ;;  %v362_v20 = vld [vmem:[%s1158_s3 + $0x8] sm:$0xff]  ;;  %v470_v22 = vld [vmem:[%s1160_s5 + $0x78] sm:$0xff]  ;;  %s564_s16 = sshll.u32 %s269_s15, 4  ;;  %s804_s23 = scalar_lea.vmem %s803_s22, 256  ;;  %s565_s16 = int_to_ptr.vmem [resolvable:$true] %s564_s16 }
  0x1a   : > { %682 = vmatprep.subr.mxu0 %v860_v1  ;;  %692 = vmatpush3.msra.mxu1 %v374_v6  ;;  %v361_v21 = vld [vmem:[%s1158_s3] sm:$0xff]  ;;  %v469_v23 = vld [vmem:[%s1160_s5 + $0x70] sm:$0xff]  ;;  %v468_v24 = vld [vmem:[%s1160_s5 + $0x68] sm:$0xff]  ;;  %s798_s21 = scalar_lea.vmem %s565_s16, 128  ;;  %p805_p0 = scmp.lt.s32.totalorder %s565_s16, %s803_s22 }
  0x1b   : > { %683 = vmatpush3.msra.mxu0 %v275_v7  ;;  %693 = vmatprep.subr.mxu1 %v860_v1  ;;  %v467_v25 = vld [vmem:[%s1160_s5 + $0x60] sm:$0xff]  ;;  %v466_v26 = vld [vmem:[%s1160_s5 + $0x58] sm:$0xff]  ;;  %v465_v27 = vld [vmem:[%s1160_s5 + $0x50] sm:$0xff]  ;;  %p799_p11 = scmp.ne.s32.totalorder %s565_s16, %s798_s21  ;;  %p806_p1 = scmp.lt.s32.totalorder %s804_s23, %s798_s21 }
  0x1c   : > { %685 = vmatmul.mubr.msk.f32.vlgmr.msra.gmra.mxu0 %vm286_vm1, %v274_v8  ;;  %694 = vmatpush3.msra.mxu1 %v373_v9  ;;  %v464_v28 = vld [vmem:[%s1160_s5 + $0x48] sm:$0xff]  ;;  %v463_v29 = vld [vmem:[%s1160_s5 + $0x40] sm:$0xff]  ;;  %v462_v30 = vld [vmem:[%s1160_s5 + $0x38] sm:$0xff] }
  0x1d   : > { %695 = vmatprep.subr.mxu1 %v860_v1  ;;  %719 = vmatprep.mubr.msk.f32.mxu1 %vm861_vm0, %v860_v1  ;;  %v461_v31 = vld [vmem:[%s1160_s5 + $0x30] sm:$0xff]  ;;  %v460_v32 = vld [vmem:[%s1160_s5 + $0x28] sm:$0xff]  ;;  %v459_v33 = vld [vmem:[%s1160_s5 + $0x20] sm:$0xff]  ;;  %p800_p12 = pnand %p799_p11, %p941_p5  ;;  %p807_p2 = por %p806_p1, %p805_p0 }
  0x1e   : > { %696 = vmatpush3.msra.mxu1 %v372_v10  ;;  %722 = vmatprep.subr.mxu0 %v860_v1  ;;  %v458_v34 = vld [vmem:[%s1160_s5 + $0x18] sm:$0xff]  ;;  %v629_v35 = vld [vmem:[%s1157_s2] ss:$0 sm:$0xff]  ;;  %v457_v40 = vld [vmem:[%s1160_s5 + $0x10] sm:$0xff] }
  0x1f   : > { %697 = vmatprep.subr.mxu1 %v860_v1  ;;  %754 = vmatprep.mubr.msk.f32.mxu0 %vm861_vm0, %v860_v1  ;;  %v456_v41 = vld [vmem:[%s1160_s5 + $0x8] sm:$0xff]  ;;  %v455_v42 = vld [vmem:[%s1160_s5] sm:$0xff]  ;;  %p801_p13 = pneg %p800_p12 }
  0x20   : > { %698 = vmatpush3.msra.mxu1 %v371_v11  ;;  %723 = vmatpush3.msra.mxu0 %v470_v22  ;;  %v631_v43 = vld [vmem:[%s1159_s4] ss:$0 sm:$0xff] }
  0x21   : > { %699 = vmatprep.subr.mxu1 %v860_v1  ;;  %724 = vmatprep.subr.mxu0 %v860_v1  ;;  %v632_v48 = vld [vmem:[%s1161_s6] ss:$0 sm:$0xff]  ;;  %p808_p3 = pnand %p807_p2, %p801_p13 }
  0x22   : > { %700 = vmatpush3.msra.mxu1 %v370_v12  ;;  %725 = vmatpush3.msra.mxu0 %v469_v23 }
  0x23   : > { %701 = vmatprep.subr.mxu1 %v860_v1  ;;  %726 = vmatprep.subr.mxu0 %v860_v1 }
  0x24   : > { %702 = vmatpush3.msra.mxu1 %v369_v13  ;;  %727 = vmatpush3.msra.mxu0 %v468_v24 }
  0x25   : > { %703 = vmatprep.subr.mxu1 %v860_v1  ;;  %728 = vmatprep.subr.mxu0 %v860_v1 }
  0x26   : > { %704 = vmatpush3.msra.mxu1 %v368_v14  ;;  %729 = vmatpush3.msra.mxu0 %v467_v25 }
  0x27   : > { %705 = vmatprep.subr.mxu1 %v860_v1  ;;  %730 = vmatprep.subr.mxu0 %v860_v1 }
  0x28   : > { %706 = vmatpush3.msra.mxu1 %v367_v15  ;;  %731 = vmatpush3.msra.mxu0 %v466_v26 }
  0x29   : > { %707 = vmatprep.subr.mxu1 %v860_v1  ;;  %732 = vmatprep.subr.mxu0 %v860_v1 }
  0x2a   : > { %708 = vmatpush3.msra.mxu1 %v366_v16  ;;  %733 = vmatpush3.msra.mxu0 %v465_v27 }
  0x2b   : > { %709 = vmatprep.subr.mxu1 %v860_v1  ;;  %734 = vmatprep.subr.mxu0 %v860_v1 }
  0x2c   : > { %710 = vmatpush3.msra.mxu1 %v365_v17  ;;  %735 = vmatpush3.msra.mxu0 %v464_v28 }
  0x2d   : > { %711 = vmatprep.subr.mxu1 %v860_v1  ;;  %736 = vmatprep.subr.mxu0 %v860_v1 }
  0x2e   : > { %712 = vmatpush3.msra.mxu1 %v364_v18  ;;  %737 = vmatpush3.msra.mxu0 %v463_v29 }
  0x2f   : > { %713 = vmatprep.subr.mxu1 %v860_v1  ;;  %738 = vmatprep.subr.mxu0 %v860_v1 }
  0x30   : > { %714 = vmatpush3.msra.mxu1 %v363_v19  ;;  %739 = vmatpush3.msra.mxu0 %v462_v30 }
  0x31   : > { %715 = vmatprep.subr.mxu1 %v860_v1  ;;  %740 = vmatprep.subr.mxu0 %v860_v1 }
  0x32   : > { %716 = vmatpush3.msra.mxu1 %v362_v20  ;;  %741 = vmatpush3.msra.mxu0 %v461_v31 }
  0x33   : > { %717 = vmatprep.subr.mxu1 %v860_v1  ;;  %742 = vmatprep.subr.mxu0 %v860_v1 }
  0x34   : > { %718 = vmatpush3.msra.mxu1 %v361_v21  ;;  %743 = vmatpush3.msra.mxu0 %v460_v32 }
  0x35   : > { %744 = vmatprep.subr.mxu0 %v860_v1 }
  0x36   : > { %745 = vmatpush3.msra.mxu0 %v459_v33 }
  0x37   : > { %746 = vmatprep.subr.mxu0 %v860_v1 }
  0x38   : > { %747 = vmatpush3.msra.mxu0 %v458_v34 }
  0x39   : > { %748 = vmatprep.subr.mxu0 %v860_v1 }
  0x3a   : > { %749 = vmatpush3.msra.mxu0 %v457_v40 }
  0x3b   : > { %750 = vmatprep.subr.mxu0 %v860_v1 }
  0x3c   : > { %751 = vmatpush3.msra.mxu0 %v456_v41 }
  0x3d   : > { %752 = vmatprep.subr.mxu0 %v860_v1 }
  0x3e   : > { %753 = vmatpush3.msra.mxu0 %v455_v42 }
  0xdc   : > { %v356_v36 = vpop.f32.mrf.mxu0 }
  0xdd   : > { %v357_v37 = vadd.f32 %v629_v35, %v356_v36 }
  0xde   : > { %v686_v38 = vpop.f32.mrf.mxu0 }
  0xdf   : > { %v360_v39 = vmax.f32 %v357_v37, 0.0 }
  0xe1   : > { %720 = vmatmul.mubr.f32.vlgmr.msra.gmra.mxu1 %v360_v39 }
 0x1a1   : > { %v450_v44 = vpop.f32.mrf.mxu1 }
 0x1a2   : > { %v451_v45 = vadd.f32 %v631_v43, %v450_v44 }
 0x1a3   : > { %v721_v46 = vpop.f32.mrf.mxu1 }
 0x1a4   : > { %v454_v47 = vmax.f32 %v451_v45, 0.0 }
 0x1a6   : > { %755 = vmatmul.mubr.f32.vlgmr.msra.gmra.mxu0 %v454_v47 }
 0x266   : > { %v544_v49 = vpop.f32.mrf.mxu0 }
 0x267   : > { %v545_v50 = vadd.f32 %v632_v48, %v544_v49 }
 0x268   : > { %v756_v51 = vpop.f32.mrf.mxu0 }
 0x269   : > { %549 = vst.msk [vmem:[%s269_s15] sm:$0xff] %vm548_vm2, %v545_v50 }
 0x26a   : > { %811 = shalt.err (!%p808_p3)
}
 0x26b   : > { %s812_s8 = scalar_lea.hbm %s1120_s19, 128  ;;  %s816_s13 = scalar_lea.hbm %s1162_s7, 256 }
 0x26c   : > { %p813_p4 = scmp.ne.s32.totalorder %s1120_s19, %s812_s8  ;;  %p817_p9 = scmp.lt.s32.totalorder %s1120_s19, %s1162_s7 }
 0x26d   : > { %p818_p10 = scmp.lt.s32.totalorder %s816_s13, %s812_s8 }
 0x26e   : > { %p814_p7 = pnand %p813_p4, %p941_p5 }
 0x26f   : > { %p819_p11 = por %p818_p10, %p817_p9 }
 0x270   : > { %p815_p8 = pneg %p814_p7 }
 0x272   : > { %p820_p12 = pnand %p819_p11, %p815_p8 }
 0x274   : > { %823 = shalt.err (!%p820_p12)
}
 0x275   : > { %757 = dma.vmem_to_hbm [thread:$0]  (%p941_p5), %s565_s16, 128, %s1120_s19, %s551_s20  }
 0x276 PF: > { %p763_p13 = scmp.ge.s32.totalorder %s858_s27, 2  ;;  %s576_s17 = sand.u32 1, %s846_s24  }
 0x277   : > { %s577_s18 = scalar_lea.sflag [#allocation3], %s576_s17 }
 0x278   : > { %p760_p0 = pnand %p763_p13, %p945_p6 }
 0x27a   : > { %p761_p1 = pneg %p760_p0 }
 0x27c   : > { %841 = dma.done.wait (%p761_p1), %s577_s18, 128  }
 0x27d   : > { %843 = vsyncadd (%p761_p1), %s577_s18, 4294967168  ;;  %p17_p2 = scmp.ge.s32.totalorder %s928_s30, 4   ;;  %s1165_s24 = smov %s850_s25 }
 0x27e   : > { %s1166_s25 = smov %s854_s26  ;;  %s1167_s26 = smov %s939_s10 }
 0x27f   : > { %s1168_s27 = smov %s928_s30  ;;  %19 = sbr.rel (!%p17_p2) target bundleno = 3 (0x3), region = 83 }
 0x284   :  { %582 = vsyncpa [#allocation3], 1 }
 0x285   :  { %584 = vsyncpa [#allocation3 + $0x1], 1 }

</bundles_post_ra>
